<compile_context>
chip_gen: v6e
topology: v6e:2x2x1
jax: 0.10.0
libtpu: 0.0.40
codegen_flags: <defaults>
</compile_context>

<pallas_src>
import functools

import jax
import jax.numpy as jnp
from jax.experimental import pallas as pl
from jax.experimental.pallas import tpu as pltpu


def _ce_label_smooth_kernel(x_ref, t_ref, o_ref, *, epsilon, num_classes,
                            n_valid, row_tile):
    # x_ref: (TN, C) logits tile (native dtype), t_ref: (TN, 1) int32 targets,
    # o_ref: (1, 1) float32 per-tile partial sum of the row losses.
    i = pl.program_id(0)

    x = x_ref[...].astype(jnp.float32)                  # (TN, C)
    tgt = t_ref[...]                                    # (TN, 1) int32
    tn, c = x.shape

    # Numerically stable log-softmax pieces.
    m = jnp.max(x, axis=1, keepdims=True)               # (TN, 1)
    shifted = x - m                                     # (TN, C)
    lse = jnp.log(jnp.sum(jnp.exp(shifted), axis=1, keepdims=True))   # (TN, 1)

    # sum_c log_probs = sum_c shifted - C * lse.
    sum_shift = jnp.sum(shifted, axis=1, keepdims=True)                # (TN, 1)
    sum_logp = sum_shift - jnp.float32(c) * lse                        # (TN, 1)

    # log_probs[target] via a lane-iota select (one-hot equivalent without ever
    # materialising the smoothed-label tensor).
    class_ids = jax.lax.broadcasted_iota(jnp.int32, (tn, c), 1)        # (TN, C)
    tgt_shift = jnp.sum(jnp.where(class_ids == tgt, shifted, 0.0),
                        axis=1, keepdims=True)                         # (TN, 1)
    valid_tgt = jnp.logical_and(tgt >= 0, tgt < c)                     # (TN, 1)
    tgt_logp = jnp.where(valid_tgt, tgt_shift - lse, 0.0)              # (TN, 1)

    row_loss = (-(1.0 - epsilon) * tgt_logp
                - (epsilon / num_classes) * sum_logp)                  # (TN, 1)

    # Mask padding rows of the ragged last tile BEFORE reducing, so garbage
    # (possibly NaN/inf) padding rows never enter the partial sum.
    row_ids = i * row_tile + jax.lax.broadcasted_iota(jnp.int32, (tn, 1), 0)
    masked = jnp.where(row_ids < n_valid, row_loss, 0.0)               # (TN, 1)

    # Lane-dense finalisation: one (1, 1) scalar per grid step.
    o_ref[...] = jnp.sum(masked, axis=0, keepdims=True)


def _vmem_limit_bytes():
    """~3/4 of physical VMEM per TensorCore, clamped to [32 MiB, 96 MiB]."""
    try:
        cap = int(pltpu.get_tpu_info().vmem_capacity_bytes)
    except Exception:
        cap = 64 * 1024 * 1024          # conservative (v7x per-TC physical)
    return max(32 * 1024 * 1024, min((cap * 3) // 4, 96 * 1024 * 1024))


def cross_entropy_label_smooth(inputs, targets, *, num_classes, epsilon,
                               row_tile=None):
    """inputs: (N, C) logits (any float dtype); targets: (N,) int class ids."""
    n, c = inputs.shape
    assert c == num_classes
    targets_2d = targets.astype(jnp.int32).reshape(n, 1)

    itemsize = jnp.dtype(inputs.dtype).itemsize
    # Native sublane multiple: 8 for f32, 16 for bf16, 32 for int8/fp8.
    align = max(8, 32 // itemsize)

    vmem_limit = _vmem_limit_bytes()

    if row_tile is None:
        # Size the tile against the real per-step VMEM footprint.  The class
        # dim is counted at its lane-padded width (blocks pad lanes to 128).
        c_pad = ((c + 127) // 128) * 128
        per_row_bytes = (2 * c_pad * itemsize    # double-buffered input tile
                         + 4 * c_pad * 4         # f32/int32 (TN, C) temporaries
                         + 2 * 512)              # lane-padded (TN, 1) targets x2
        footprint_budget = vmem_limit // 2       # headroom for compiler scratch
        row_tile = footprint_budget // per_row_bytes
        row_tile = max(align, (row_tile // align) * align)
    else:
        row_tile = max(align, (int(row_tile) // align) * align)

    if n > row_tile:
        tn = row_tile
        num_tiles = pl.cdiv(n, tn)
    elif n > align:
        # Split even a small batch into >= 2 tiles so both v7x TensorCores run.
        tn = ((pl.cdiv(n, 2) + align - 1) // align) * align
        num_tiles = pl.cdiv(n, tn)
    else:
        tn = n                    # single full-array block (always layout-legal)
        num_tiles = 1

    kernel = functools.partial(
        _ce_label_smooth_kernel,
        epsilon=float(epsilon),
        num_classes=int(num_classes),
        n_valid=int(n),
        row_tile=int(tn),
    )

    cost = pl.CostEstimate(
        flops=6 * n * c,
        transcendentals=n * c + n,
        bytes_accessed=n * c * itemsize + n * 4 + num_tiles * 4,
    )

    per_tile = pl.pallas_call(
        kernel,
        out_shape=jax.ShapeDtypeStruct((num_tiles, 1), jnp.float32),
        grid=(num_tiles,),
        in_specs=[
            pl.BlockSpec((tn, c), lambda i: (i, 0)),
            pl.BlockSpec((tn, 1), lambda i: (i, 0)),
        ],
        out_specs=pl.BlockSpec((1, 1), lambda i: (i, 0)),
        compiler_params=pltpu.CompilerParams(
            dimension_semantics=("parallel",),
            vmem_limit_bytes=int(vmem_limit),
        ),
        cost_estimate=cost,
    )(inputs, targets_2d)

    # Finalize: sum the num_tiles partial sums and divide by N once.
    return jnp.sum(per_tile) / jnp.float32(n)


def _reference(inputs, targets, *, num_classes, epsilon):
    log_probs = jax.nn.log_softmax(inputs.astype(jnp.float32), axis=1)
    one_hot = jax.nn.one_hot(targets, num_classes, dtype=jnp.float32)
    smooth = (1.0 - epsilon) * one_hot + epsilon / num_classes
    return (-smooth * log_probs).mean(0).sum()


if __name__ == "__main__":
    num_classes = 32
    epsilon = 0.1
    batch = 8

    key = jax.random.PRNGKey(0)
    k1, k2 = jax.random.split(key)
    inputs = jax.random.normal(k1, (batch, num_classes), dtype=jnp.float32)
    targets = jax.random.randint(k2, (batch,), 0, num_classes, dtype=jnp.int32)

    loss = cross_entropy_label_smooth(
        inputs, targets, num_classes=num_classes, epsilon=epsilon
    )
    loss = jax.block_until_ready(loss)

    ref = _reference(inputs, targets, num_classes=num_classes, epsilon=epsilon)
    assert jnp.allclose(loss, ref, rtol=1e-5, atol=1e-5), (loss, ref)

    # Also exercise the multi-tile, masked-remainder, bf16 (native-dtype) path
    # with a forced small row_tile.
    batch2, classes2 = 300, 256          # 300 rows -> ragged last tile
    k3, k4 = jax.random.split(k2)
    x2 = jax.random.normal(k3, (batch2, classes2), dtype=jnp.bfloat16)
    t2 = jax.random.randint(k4, (batch2,), 0, classes2, dtype=jnp.int32)
    loss2 = jax.block_until_ready(
        cross_entropy_label_smooth(
            x2, t2, num_classes=classes2, epsilon=epsilon, row_tile=64
        )
    )
    ref2 = _reference(x2, t2, num_classes=classes2, epsilon=epsilon)
    assert jnp.allclose(loss2, ref2, rtol=2e-2, atol=2e-2), (loss2, ref2)

    # And the auto-tiled (default row_tile) path on the same data.
    loss3 = jax.block_until_ready(
        cross_entropy_label_smooth(
            x2, t2, num_classes=classes2, epsilon=epsilon
        )
    )
    assert jnp.allclose(loss3, ref2, rtol=2e-2, atol=2e-2), (loss3, ref2)

    print("KERNEL_OK")
</pallas_src>

<mosaic_0001>
module attributes {stable_mosaic.version = 11 : i64} {
  func.func @_ce_label_smooth_kernel(%arg0: i32, %arg1: memref<8x32xf32, #tpu.memory_space<vmem>>, %arg2: memref<8x1xi32, #tpu.memory_space<vmem>>, %arg3: memref<1x1xf32, #tpu.memory_space<vmem>>) attributes {dimension_semantics = [#tpu.dimension_semantics<parallel>], iteration_bounds = array<i64: 1>, scalar_prefetch = 0 : i64, scratch_operands = 0 : i64, tpu.core_type = #tpu.core_type<tc>, window_params = [{transform_indices = @transform_0, window_bounds = array<i64: 8, 32>}, {transform_indices = @transform_1, window_bounds = array<i64: 8, 1>}, {transform_indices = @transform_2, window_bounds = array<i64: 1, 1>}]} {
    %c0 = arith.constant 0 : index
    %c0_0 = arith.constant 0 : index
    %0 = vector.load %arg1[%c0, %c0_0] : memref<8x32xf32, #tpu.memory_space<vmem>>, vector<8x32xf32>
    %c0_1 = arith.constant 0 : index
    %c0_2 = arith.constant 0 : index
    %1 = vector.load %arg2[%c0_1, %c0_2] : memref<8x1xi32, #tpu.memory_space<vmem>>, vector<8x1xi32>
    %cst = arith.constant dense<0xFF800000> : vector<8xf32>
    %2 = vector.multi_reduction <maximumf>, %0, %cst [1] : vector<8x32xf32> to vector<8xf32>
    %3 = vector.shape_cast %2 : vector<8xf32> to vector<8x1xf32>
    %4 = vector.broadcast %3 : vector<8x1xf32> to vector<8x32xf32>
    %5 = arith.subf %0, %4 : vector<8x32xf32>
    %6 = math.exp %5 : vector<8x32xf32>
    %cst_3 = arith.constant dense<0.000000e+00> : vector<8xf32>
    %7 = vector.multi_reduction <add>, %6, %cst_3 [1] : vector<8x32xf32> to vector<8xf32>
    %8 = vector.shape_cast %7 : vector<8xf32> to vector<8x1xf32>
    %9 = math.log %8 : vector<8x1xf32>
    %cst_4 = arith.constant dense<0.000000e+00> : vector<8xf32>
    %10 = vector.multi_reduction <add>, %5, %cst_4 [1] : vector<8x32xf32> to vector<8xf32>
    %11 = vector.shape_cast %10 : vector<8xf32> to vector<8x1xf32>
    %cst_5 = arith.constant 3.200000e+01 : f32
    %12 = vector.broadcast %cst_5 : f32 to vector<8x1xf32>
    %13 = arith.mulf %12, %9 : vector<8x1xf32>
    %14 = arith.subf %11, %13 : vector<8x1xf32>
    %15 = tpu.iota {dimensions = array<i32: 1>} : vector<8x32xi32>
    %16 = vector.broadcast %1 : vector<8x1xi32> to vector<8x32xi32>
    %17 = arith.cmpi eq, %15, %16 : vector<8x32xi32>
    %cst_6 = arith.constant 0.000000e+00 : f32
    %18 = vector.broadcast %cst_6 : f32 to vector<8x32xf32>
    %19 = arith.select %17, %5, %18 : vector<8x32xi1>, vector<8x32xf32>
    %cst_7 = arith.constant dense<0.000000e+00> : vector<8xf32>
    %20 = vector.multi_reduction <add>, %19, %cst_7 [1] : vector<8x32xf32> to vector<8xf32>
    %21 = vector.shape_cast %20 : vector<8xf32> to vector<8x1xf32>
    %c0_i32 = arith.constant 0 : i32
    %22 = vector.broadcast %c0_i32 : i32 to vector<8x1xi32>
    %23 = arith.cmpi sge, %1, %22 : vector<8x1xi32>
    %c32_i32 = arith.constant 32 : i32
    %24 = vector.broadcast %c32_i32 : i32 to vector<8x1xi32>
    %25 = arith.cmpi slt, %1, %24 : vector<8x1xi32>
    %26 = arith.andi %23, %25 : vector<8x1xi1>
    %27 = arith.subf %21, %9 : vector<8x1xf32>
    %cst_8 = arith.constant 0.000000e+00 : f32
    %28 = vector.broadcast %cst_8 : f32 to vector<8x1xf32>
    %29 = arith.select %26, %27, %28 : vector<8x1xi1>, vector<8x1xf32>
    %cst_9 = arith.constant -0.899999976 : f32
    %30 = vector.broadcast %cst_9 : f32 to vector<8x1xf32>
    %31 = arith.mulf %30, %29 : vector<8x1xf32>
    %cst_10 = arith.constant 3.125000e-03 : f32
    %32 = vector.broadcast %cst_10 : f32 to vector<8x1xf32>
    %33 = arith.mulf %32, %14 : vector<8x1xf32>
    %34 = arith.subf %31, %33 : vector<8x1xf32>
    %c8_i32 = arith.constant 8 : i32
    %35 = arith.muli %arg0, %c8_i32 : i32
    %36 = tpu.iota {dimensions = array<i32: 0>} : vector<8x1xi32>
    %37 = vector.broadcast %35 : i32 to vector<8x1xi32>
    %38 = arith.addi %37, %36 : vector<8x1xi32>
    %c8_i32_11 = arith.constant 8 : i32
    %39 = vector.broadcast %c8_i32_11 : i32 to vector<8x1xi32>
    %40 = arith.cmpi slt, %38, %39 : vector<8x1xi32>
    %cst_12 = arith.constant 0.000000e+00 : f32
    %41 = vector.broadcast %cst_12 : f32 to vector<8x1xf32>
    %42 = arith.select %40, %34, %41 : vector<8x1xi1>, vector<8x1xf32>
    %cst_13 = arith.constant dense<0.000000e+00> : vector<1xf32>
    %43 = vector.multi_reduction <add>, %42, %cst_13 [0] : vector<8x1xf32> to vector<1xf32>
    %44 = vector.shape_cast %43 : vector<1xf32> to vector<1x1xf32>
    %c0_14 = arith.constant 0 : index
    %c0_15 = arith.constant 0 : index
    %45 = vector.load %arg3[%c0_14, %c0_15] : memref<1x1xf32, #tpu.memory_space<vmem>>, vector<1x1xf32>
    tpu.vector_store %arg3[%c0_14, %c0_15], %44 {strides = array<i32>} : memref<1x1xf32, #tpu.memory_space<vmem>>, vector<1x1xf32>,
    return
  }
  func.func @transform_0(%arg0: i32) -> (i32, i32) {
    %c0_i32 = arith.constant 0 : i32
    %c0_i32_0 = arith.constant 0 : i32
    return %arg0, %c0_i32 : i32, i32
  }
  func.func @transform_1(%arg0: i32) -> (i32, i32) {
    %c0_i32 = arith.constant 0 : i32
    %c0_i32_0 = arith.constant 0 : i32
    return %arg0, %c0_i32 : i32, i32
  }
  func.func @transform_2(%arg0: i32) -> (i32, i32) {
    %c0_i32 = arith.constant 0 : i32
    %c0_i32_0 = arith.constant 0 : i32
    return %arg0, %c0_i32 : i32, i32
  }
}

</mosaic_0001>

<bundles_post_ra>
// kernel: tpu_custom_call.1
= control target key start
LH: loop header
LB: loop body
LE: loop exit
PB: predicated region body
PF: predicated region fallthrough
CT: control target
= control target key end

     0   :  { %vm14_vm0 = vcmask 261120   ;;  %s139_s0 = inlined_call_operand.vmem [shape: f32[8,32], index: 0, kind: input, shape index: {}]   ;;  %s140_s1 = inlined_call_operand.vmem [shape: s32[8,1], index: 1, kind: input, shape index: {}]   ;;  %s141_s2 = inlined_call_operand.hbm [shape: f32[1,1], index: 2, kind: output, shape index: {}]  }
   0x1   :  { %v12_v0 = vld [vmem:[%s139_s0] sm:$0xff] }
   0x2   :  { %7 = vsyncpa [#allocation3], 0  ;;  %v15_v1 = vsel %vm14_vm0, %v12_v0, -inf  ;;  %v109_v2 = vmov 0   ;;  %v13_v3 = vld [vmem:[%s140_s1] sm:$0xff]  ;;  %v31_v7 = vlaneseq  ;;  %vm56_vm5 = vcmask 7168  }
   0x3   :  { %82 = vset.pattern.permute.xlu0 %v109_v2  ;;  %vm41_vm2 = vcmp.ge.s32.totalorder %v13_v3, 0  ;;  %vm42_vm3 = vcmp.lt.s32.totalorder %v13_v3, 32  ;;  %s110_s0 = smov [#allocation2]   ;;  %vm64_vm6 = vcmask 0  }
   0x4   :  { %16 = vmax.xlane.f32.xlu0 %v15_v1  ;;  %v32_v8 = vand.u32 127, %v31_v7  ;;  %vm43_vm4 = vmand %vm41_vm2, %vm42_vm3  ;;  %s72_s1 = sshll.u32 %s110_s0, 4  ;;  %s73_s1 = int_to_ptr.vmem [resolvable:$true] %s72_s1 }
   0x5   :  { %s87_s13 = scalar_lea.vmem %s73_s1, 16  ;;  %s91_s14 = scalar_lea.vmem %s73_s1, 32 }
   0x6   :  { %p88_p0 = scmp.ne.s32.totalorder %s73_s1, %s87_s13  ;;  %p92_p1 = scmp.lt.s32.totalorder %s73_s1, %s73_s1 }
   0x7   :  { %p93_p2 = scmp.lt.s32.totalorder %s91_s14, %s87_s13 }
   0x9   :  { %p94_p3 = por %p93_p2, %p92_p1 }
   0xb   :  { %p95_p4 = pnand %p94_p3, %p88_p0 }
  0x1a   :  { %34 = vperm.xlu0 %82, %v13_v3  }
  0x8d   :  { %v17_v4 = vpop.xlane.xlu0 %16 }
  0x8e   :  { %v18_v5 = vsub.f32 %v12_v0, %v17_v4 }
  0x90   :  { %v19_v6 = vmul.f32 1.442695, %v18_v5  ;;  %v26_v14 = vsel %vm14_vm0, %v18_v5, 0.0 }
  0x92   :  { %83 = vpow2.f32 %v19_v6 }
  0x95   :  { %v35_v9 = vpop.permute.xlu0 %34 }
  0x96   :  { %vm36_vm1 = vcmp.eq.s32.totalorder %v32_v8, %v35_v9 }
  0x97   :  { %v37_v12 = vsel %vm36_vm1, %v18_v5, 0.0 }
  0x98   :  { %v38_v13 = vsel %vm14_vm0, %v37_v12, 0.0 }
  0x9f   :  { %v84_v10 = vpop.eup %83 }
  0xa0   :  { %v21_v11 = vsel %vm14_vm0, %v84_v10, 0.0 }
  0xa1   :  { %22 = vadd.xlane.f32.xlu1 %v21_v11 }
  0xa5   :  { %39 = vadd.xlane.f32.xlu1 %v38_v13 }
  0xa9   :  { %27 = vadd.xlane.f32.xlu1 %v26_v14 }
 0x12a   :  { %v23_v15 = vpop.xlane.xlu1 %22 }
 0x12b   :  { %85 = vlog2.f32 %v23_v15 }
 0x12e   :  { %v40_v16 = vpop.xlane.xlu1 %39 }
 0x132   :  { %v28_v21 = vpop.xlane.xlu1 %27 }
 0x138   :  { %v86_v17 = vpop.eup %85 }
 0x139   :  { %v25_v18 = vmul.f32 0.6931472, %v86_v17 }
 0x13b   :  { %v44_v19 = vsub.f32 %v40_v16, %v25_v18  ;;  %v29_v20 = vmul.f32 32.0, %v25_v18 }
 0x13d   :  { %v45_v22 = vsel %vm43_vm4, %v44_v19, 0.0  ;;  %v30_v23 = vsub.f32 %v28_v21, %v29_v20 }
 0x13e   :  { %v46_v24 = vmul.f32 -0.9, %v45_v22 }
 0x13f   :  { %v47_v25 = vmul.f32 0.003125, %v30_v23 }
 0x141   :  { %v48_v26 = vsub.f32 %v46_v24, %v47_v25 }
 0x143   :  { %v57_v27 = vsel %vm56_vm5, %v48_v26, 0.0 }
 0x144   :  { %v58_v28 = vrot.slane %v57_v27, 4 }
 0x146   :  { %v59_v29 = vadd.f32 %v58_v28, %v57_v27 }
 0x148   :  { %v60_v30 = vrot.slane %v59_v29, 2 }
 0x14a   :  { %v61_v31 = vadd.f32 %v60_v30, %v59_v29 }
 0x14c   :  { %v62_v32 = vrot.slane %v61_v31, 1 }
 0x14e   :  { %v63_v33 = vadd.f32 %v62_v32, %v61_v31 }
 0x150   :  { %65 = vst.msk [vmem:[#allocation2] sm:$0x1] %vm64_vm6, %v63_v33 }
 0x151   :  { %98 = shalt.err (!%p95_p4)
}
 0x152   :  { %75 = dma.vmem_to_hbm [thread:$0]  %s73_s1, 16, %s141_s2, [#allocation3]  }
 0x153   :  { %107 = dma.done.wait [#allocation3], 16  }
 0x154   :  { %108 = vsyncadd [#allocation3], 4294967280 }
 0x155   :  { %79 = vsyncpa [#allocation3], 1 }

</bundles_post_ra>
